<compile_context>
chip_gen: v6e
topology: v6e:2x2x1
jax: 0.10.0
libtpu: 0.0.40
codegen_flags: <defaults>
</compile_context>

<pallas_src>
import functools

import jax
import jax.numpy as jnp
from jax import lax
from jax.experimental import pallas as pl
from jax.experimental.pallas import tpu as pltpu

BN_EPS = 1e-5
DROPOUT_P = 0.1
INV_KEEP = 1.0 / (1.0 - DROPOUT_P)
FEATURES = 8
HIDDEN = 64
MAX_TILE = 4096                # batch rows per grid step (64 lanes wide -> 1 MiB f32)


def _round_up(n, m):
    return ((n + m - 1) // m) * m


def _tiling(n):
    tile = min(MAX_TILE, _round_up(n, 8))
    num_tiles = -(-n // tile)
    return tile, num_tiles, num_tiles * tile


def _moments_row(h, tile, n_valid):
    """(1, 2H) = [sum(h) | sum(h*h)] over valid batch rows, computed on the MXU.

    Padded rows are excluded by masking the (1, tile) ones vector (one tiny
    compare) instead of masking the (tile, H) activations; skipped statically
    when the batch divides the tile.
    """
    if n_valid % tile == 0:
        ones = jnp.ones((1, tile), jnp.float32)
    else:
        col = lax.broadcasted_iota(jnp.int32, (1, tile), 1)
        ones = jnp.where(pl.program_id(0) * tile + col < n_valid, 1.0, 0.0)
    s1 = jnp.dot(ones, h, preferred_element_type=jnp.float32)
    s2 = jnp.dot(ones, h * h, preferred_element_type=jnp.float32)
    return jnp.concatenate([s1, s2], axis=1)


def _stage1_kernel(n_valid, x_ref, w1_ref, b1_ref, h1_ref, stats_ref):
    """h1 = relu(x @ W1 + b1) (stored bf16); per-tile BN1 sum / sum-of-squares."""
    tile = x_ref.shape[0]
    h = jnp.dot(x_ref[...], w1_ref[...], preferred_element_type=jnp.float32)
    h = jnp.maximum(h + b1_ref[...], 0.0)
    stats_ref[...] = _moments_row(h, tile, n_valid).reshape(1, 1, 2 * HIDDEN)
    h1_ref[...] = h.astype(h1_ref.dtype)


def _stage2_kernel(n_valid, h1_ref, w2_ref, b2_ref, h2_ref, stats_ref):
    """h2 = relu(bn1(h1) @ W2 + b2), with BN1 pre-folded into W2/b2 (wrapper)."""
    tile = h1_ref.shape[0]
    h = jnp.dot(h1_ref[...], w2_ref[...], preferred_element_type=jnp.float32)
    h = jnp.maximum(h + b2_ref[...], 0.0)
    stats_ref[...] = _moments_row(h, tile, n_valid).reshape(1, 1, 2 * HIDDEN)
    h2_ref[...] = h.astype(h2_ref.dtype)


def _stage3_kernel(h2_ref, sc2_ref, sh2_ref, drop_ref, w3_ref, b3_ref, o_ref):
    """out = dropout(bn2(h2)) @ W3 + b3, emitted as a lane-dense (1, tile) row."""
    tile = h2_ref.shape[0]
    z = h2_ref[...].astype(jnp.float32) * sc2_ref[...] + sh2_ref[...]     # batchnorm2
    z = z * drop_ref[...].astype(jnp.float32)        # inverted dropout (pre-scaled mask)
    row = lax.dot_general(w3_ref[...], z, (((1,), (1,)), ((), ())),
                          preferred_element_type=jnp.float32)             # (1, tile)
    o_ref[...] = (row + b3_ref[...]).reshape(1, 1, tile)


def _bn_scale_shift(stats_vec, n, gamma, beta):
    """Fold biased batch mean/var + affine params into per-feature scale/shift."""
    mean = stats_vec[:HIDDEN] / n
    var = jnp.maximum(stats_vec[HIDDEN:] / n - mean * mean, 0.0)
    scale = gamma * lax.rsqrt(var + BN_EPS)
    shift = beta - mean * scale
    return scale, shift


def _dropout_mask(seed, rows, cols):
    """Pre-scaled inverted-dropout keep mask, stored bf16 (values 0 or 1/(1-p))."""
    keep = jax.random.bernoulli(jax.random.PRNGKey(seed), 1.0 - DROPOUT_P, (rows, cols))
    return (keep.astype(jnp.float32) * INV_KEEP).astype(jnp.bfloat16)


@jax.jit
def binary_classification_forward(inputs, params, seed):
    """inputs: (N, 8) float32.  Returns (N, 1) float32 logits (train-mode forward)."""
    w1, b1, g1, be1, w2, b2, g2, be2, w3, b3 = params
    n = inputs.shape[0]
    tile, num_tiles, n_pad = _tiling(n)

    x = inputs.astype(jnp.float32)
    if n_pad != n:
        x = jnp.pad(x, ((0, n_pad - n), (0, 0)))

    f32 = lambda a: a.astype(jnp.float32)
    row = lambda v: f32(v).reshape(1, -1)

    tiled = lambda width: pl.BlockSpec((tile, width), lambda i: (i, 0))
    resident = lambda shape: pl.BlockSpec(shape, lambda i: (0,) * len(shape))
    stats_spec = pl.BlockSpec((1, 1, 2 * HIDDEN), lambda i: (i, 0, 0))
    stats_shape = jax.ShapeDtypeStruct((num_tiles, 1, 2 * HIDDEN), jnp.float32)
    act_shape = jax.ShapeDtypeStruct((n_pad, HIDDEN), jnp.bfloat16)
    cparams = pltpu.CompilerParams(dimension_semantics=("parallel",))

    # ---- stage 1: layer_1 + ReLU, per-tile BN1 moments ------------------------
    h1, stats1 = pl.pallas_call(
        functools.partial(_stage1_kernel, n),
        grid=(num_tiles,),
        in_specs=[tiled(FEATURES), resident((FEATURES, HIDDEN)), resident((1, HIDDEN))],
        out_specs=(tiled(HIDDEN), stats_spec),
        out_shape=(act_shape, stats_shape),
        compiler_params=cparams,
        cost_estimate=pl.CostEstimate(
            flops=2 * n_pad * HIDDEN * (FEATURES + 2), transcendentals=0,
            bytes_accessed=n_pad * (4 * FEATURES + 2 * HIDDEN)),
    )(x, f32(w1).T, row(b1))
    sc1, sh1 = _bn_scale_shift(stats1.reshape(num_tiles, -1).sum(axis=0),
                               n, f32(g1), f32(be1))

    # ---- stage 2: (BN1-folded) layer_2 + ReLU, per-tile BN2 moments ------------
    w2t = f32(w2).T
    w2p = w2t * sc1[:, None]                       # fold BN1 scale into the weights
    b2p = (f32(b2) + sh1 @ w2t).reshape(1, -1)     # fold BN1 shift into the bias
    h2, stats2 = pl.pallas_call(
        functools.partial(_stage2_kernel, n),
        grid=(num_tiles,),
        in_specs=[tiled(HIDDEN), resident((HIDDEN, HIDDEN)), resident((1, HIDDEN))],
        out_specs=(tiled(HIDDEN), stats_spec),
        out_shape=(act_shape, stats_shape),
        compiler_params=cparams,
        cost_estimate=pl.CostEstimate(
            flops=2 * n_pad * HIDDEN * (HIDDEN + 2), transcendentals=0,
            bytes_accessed=n_pad * 4 * HIDDEN),
    )(h1, w2p, b2p)
    sc2, sh2 = _bn_scale_shift(stats2.reshape(num_tiles, -1).sum(axis=0),
                               n, f32(g2), f32(be2))

    # ---- stage 3: BN2 + dropout + lane-dense (1, tile) output row --------------
    drop = _dropout_mask(seed, n_pad, HIDDEN)
    out = pl.pallas_call(
        _stage3_kernel,
        grid=(num_tiles,),
        in_specs=[tiled(HIDDEN), resident((1, HIDDEN)), resident((1, HIDDEN)),
                  tiled(HIDDEN), resident((1, HIDDEN)), resident((1, 1))],
        out_specs=pl.BlockSpec((1, 1, tile), lambda i: (i, 0, 0)),
        out_shape=jax.ShapeDtypeStruct((num_tiles, 1, tile), jnp.float32),
        compiler_params=cparams,
        cost_estimate=pl.CostEstimate(
            flops=2 * n_pad * HIDDEN, transcendentals=0,
            bytes_accessed=n_pad * (4 * HIDDEN + 4)),
    )(h2, sc2.reshape(1, -1), sh2.reshape(1, -1), drop, f32(w3), f32(b3).reshape(1, 1))

    return out.reshape(n_pad)[:n].reshape(n, 1)


def _reference_forward(x, params, drop_mask):
    """Pure-JAX reference of the train-mode forward (same pre-scaled mask)."""
    w1, b1, g1, be1, w2, b2, g2, be2, w3, b3 = params

    def bn(h, g, be):
        m = jnp.mean(h, axis=0)
        v = jnp.mean((h - m) ** 2, axis=0)
        return (h - m) / jnp.sqrt(v + BN_EPS) * g + be

    h = jnp.maximum(x @ w1.T + b1, 0.0)
    h = bn(h, g1, be1)
    h = jnp.maximum(h @ w2.T + b2, 0.0)
    h = bn(h, g2, be2)
    h = h * drop_mask
    return h @ w3.T + b3


def init_params(key):
    """Deterministic synthetic init with PyTorch nn.Linear parameter shapes."""
    ks = jax.random.split(key, 8)

    def linear(kw, kb, fan_in, fan_out):
        bound = 1.0 / (fan_in ** 0.5)
        w = jax.random.uniform(kw, (fan_out, fan_in), jnp.float32, -bound, bound)
        b = jax.random.uniform(kb, (fan_out,), jnp.float32, -bound, bound)
        return w, b

    w1, b1 = linear(ks[0], ks[1], FEATURES, HIDDEN)
    w2, b2 = linear(ks[2], ks[3], HIDDEN, HIDDEN)
    w3, b3 = linear(ks[4], ks[5], HIDDEN, 1)
    g1 = 1.0 + 0.1 * jax.random.normal(ks[6], (HIDDEN,), jnp.float32)
    be1 = 0.05 * jnp.arange(HIDDEN, dtype=jnp.float32) / HIDDEN
    g2 = 1.0 + 0.1 * jax.random.normal(ks[7], (HIDDEN,), jnp.float32)
    be2 = -0.05 * jnp.arange(HIDDEN, dtype=jnp.float32) / HIDDEN
    return (w1, b1, g1, be1, w2, b2, g2, be2, w3, b3)


if __name__ == "__main__":
    key = jax.random.PRNGKey(0)
    k_x, k_p = jax.random.split(key)
    params = init_params(k_p)
    SEED = 0

    # N=16 (exact tile) and N=13 (exercises the padded-row BN masking path).
    for n in (16, 13):
        x = jax.random.normal(jax.random.fold_in(k_x, n), (n, FEATURES), jnp.float32)
        out = jax.block_until_ready(binary_classification_forward(x, params, SEED))

        assert out.shape == (n, 1) and out.dtype == jnp.float32
        assert bool(jnp.all(jnp.isfinite(out)))

        # Numerical sanity check against a pure-JAX reference using the same mask
        # (tolerance loosened slightly for the bf16 h1/h2 intermediates).
        _, _, n_pad = _tiling(n)
        drop = _dropout_mask(SEED, n_pad, HIDDEN)[:n].astype(jnp.float32)
        ref = _reference_forward(x, params, drop)
        assert bool(jnp.allclose(out, ref, atol=2e-2, rtol=2e-2)), \
            float(jnp.max(jnp.abs(out - ref)))

    print("KERNEL_OK")
</pallas_src>

<mosaic_0001>
module attributes {stable_mosaic.version = 11 : i64} {
  func.func @_stage1_kernel(%arg0: i32, %arg1: memref<16x8xf32, #tpu.memory_space<vmem>>, %arg2: memref<8x64xf32, #tpu.memory_space<vmem>>, %arg3: memref<1x64xf32, #tpu.memory_space<vmem>>, %arg4: memref<16x64xbf16, #tpu.memory_space<vmem>>, %arg5: memref<1x1x128xf32, #tpu.memory_space<vmem>>) attributes {dimension_semantics = [#tpu.dimension_semantics<parallel>], iteration_bounds = array<i64: 1>, scalar_prefetch = 0 : i64, scratch_operands = 0 : i64, tpu.core_type = #tpu.core_type<tc>, window_params = [{transform_indices = @transform_0, window_bounds = array<i64: 16, 8>}, {pipeline_mode = #tpu.pipeline_mode<synchronous>, transform_indices = @transform_1, window_bounds = array<i64: 8, 64>}, {pipeline_mode = #tpu.pipeline_mode<synchronous>, transform_indices = @transform_2, window_bounds = array<i64: 1, 64>}, {transform_indices = @transform_3, window_bounds = array<i64: 16, 64>}, {transform_indices = @transform_4, window_bounds = array<i64: 1, 1, 128>}]} {
    %c0 = arith.constant 0 : index
    %c0_0 = arith.constant 0 : index
    %0 = vector.load %arg1[%c0, %c0_0] : memref<16x8xf32, #tpu.memory_space<vmem>>, vector<16x8xf32>
    %c0_1 = arith.constant 0 : index
    %c0_2 = arith.constant 0 : index
    %1 = vector.load %arg2[%c0_1, %c0_2] : memref<8x64xf32, #tpu.memory_space<vmem>>, vector<8x64xf32>
    %cst = arith.constant dense<0.000000e+00> : vector<16x64xf32>
    %2 = tpu.matmul %0, %1, %cst {dimension_numbers = #tpu.dot_dimension_numbers<[1], [0], [0], [1], [0, 0, 1, 1], [], []>} : vector<16x8xf32>, vector<8x64xf32>, vector<16x64xf32> -> vector<16x64xf32>
    %c0_3 = arith.constant 0 : index
    %c0_4 = arith.constant 0 : index
    %3 = vector.load %arg3[%c0_3, %c0_4] : memref<1x64xf32, #tpu.memory_space<vmem>>, vector<1x64xf32>
    %4 = vector.broadcast %3 : vector<1x64xf32> to vector<16x64xf32>
    %5 = arith.addf %2, %4 : vector<16x64xf32>
    %cst_5 = arith.constant 0.000000e+00 : f32
    %6 = vector.broadcast %cst_5 : f32 to vector<16x64xf32>
    %7 = arith.maximumf %5, %6 : vector<16x64xf32>
    %cst_6 = arith.constant 1.000000e+00 : f32
    %8 = vector.broadcast %cst_6 : f32 to vector<1x16xf32>
    %cst_7 = arith.constant dense<0.000000e+00> : vector<1x64xf32>
    %9 = tpu.matmul %8, %7, %cst_7 {dimension_numbers = #tpu.dot_dimension_numbers<[1], [0], [0], [1], [0, 0, 1, 1], [], []>} : vector<1x16xf32>, vector<16x64xf32>, vector<1x64xf32> -> vector<1x64xf32>
    %10 = arith.mulf %7, %7 : vector<16x64xf32>
    %cst_8 = arith.constant dense<0.000000e+00> : vector<1x64xf32>
    %11 = tpu.matmul %8, %10, %cst_8 {dimension_numbers = #tpu.dot_dimension_numbers<[1], [0], [0], [1], [0, 0, 1, 1], [], []>} : vector<1x16xf32>, vector<16x64xf32>, vector<1x64xf32> -> vector<1x64xf32>
    %12 = tpu.concatenate %9, %11 in 1 : vector<1x64xf32>, vector<1x64xf32> -> vector<1x128xf32>
    %13 = vector.shape_cast %12 : vector<1x128xf32> to vector<1x1x128xf32>
    %c0_9 = arith.constant 0 : index
    %c0_10 = arith.constant 0 : index
    %c0_11 = arith.constant 0 : index
    %14 = vector.load %arg5[%c0_9, %c0_10, %c0_11] : memref<1x1x128xf32, #tpu.memory_space<vmem>>, vector<1x1x128xf32>
    tpu.vector_store %arg5[%c0_9, %c0_10, %c0_11], %13 {strides = array<i32>} : memref<1x1x128xf32, #tpu.memory_space<vmem>>, vector<1x1x128xf32>,
    %15 = arith.truncf %7 : vector<16x64xf32> to vector<16x64xbf16>
    %c0_12 = arith.constant 0 : index
    %c0_13 = arith.constant 0 : index
    %16 = vector.load %arg4[%c0_12, %c0_13] : memref<16x64xbf16, #tpu.memory_space<vmem>>, vector<16x64xbf16>
    tpu.vector_store %arg4[%c0_12, %c0_13], %15 {strides = array<i32>} : memref<16x64xbf16, #tpu.memory_space<vmem>>, vector<16x64xbf16>,
    return
  }
  func.func @transform_0(%arg0: i32) -> (i32, i32) {
    %c0_i32 = arith.constant 0 : i32
    %c0_i32_0 = arith.constant 0 : i32
    return %arg0, %c0_i32 : i32, i32
  }
  func.func @transform_1(%arg0: i32) -> (i32, i32) {
    %c0_i32 = arith.constant 0 : i32
    %c0_i32_0 = arith.constant 0 : i32
    %c0_i32_1 = arith.constant 0 : i32
    return %c0_i32, %c0_i32_0 : i32, i32
  }
  func.func @transform_2(%arg0: i32) -> (i32, i32) {
    %c0_i32 = arith.constant 0 : i32
    %c0_i32_0 = arith.constant 0 : i32
    %c0_i32_1 = arith.constant 0 : i32
    return %c0_i32, %c0_i32_0 : i32, i32
  }
  func.func @transform_3(%arg0: i32) -> (i32, i32) {
    %c0_i32 = arith.constant 0 : i32
    %c0_i32_0 = arith.constant 0 : i32
    return %arg0, %c0_i32 : i32, i32
  }
  func.func @transform_4(%arg0: i32) -> (i32, i32, i32) {
    %c0_i32 = arith.constant 0 : i32
    %c0_i32_0 = arith.constant 0 : i32
    %c0_i32_1 = arith.constant 0 : i32
    return %arg0, %c0_i32, %c0_i32_0 : i32, i32, i32
  }
}

module attributes {stable_mosaic.version = 11 : i64} {
  func.func @_stage2_kernel(%arg0: i32, %arg1: memref<16x64xbf16, #tpu.memory_space<vmem>>, %arg2: memref<64x64xf32, #tpu.memory_space<vmem>>, %arg3: memref<1x64xf32, #tpu.memory_space<vmem>>, %arg4: memref<16x64xbf16, #tpu.memory_space<vmem>>, %arg5: memref<1x1x128xf32, #tpu.memory_space<vmem>>) attributes {dimension_semantics = [#tpu.dimension_semantics<parallel>], iteration_bounds = array<i64: 1>, scalar_prefetch = 0 : i64, scratch_operands = 0 : i64, tpu.core_type = #tpu.core_type<tc>, window_params = [{transform_indices = @transform_0, window_bounds = array<i64: 16, 64>}, {pipeline_mode = #tpu.pipeline_mode<synchronous>, transform_indices = @transform_1, window_bounds = array<i64: 64, 64>}, {pipeline_mode = #tpu.pipeline_mode<synchronous>, transform_indices = @transform_2, window_bounds = array<i64: 1, 64>}, {transform_indices = @transform_3, window_bounds = array<i64: 16, 64>}, {transform_indices = @transform_4, window_bounds = array<i64: 1, 1, 128>}]} {
    %c0 = arith.constant 0 : index
    %c0_0 = arith.constant 0 : index
    %0 = vector.load %arg1[%c0, %c0_0] : memref<16x64xbf16, #tpu.memory_space<vmem>>, vector<16x64xbf16>
    %c0_1 = arith.constant 0 : index
    %c0_2 = arith.constant 0 : index
    %1 = vector.load %arg2[%c0_1, %c0_2] : memref<64x64xf32, #tpu.memory_space<vmem>>, vector<64x64xf32>
    %cst = arith.constant dense<0.000000e+00> : vector<16x64xf32>
    %2 = tpu.matmul %0, %1, %cst {dimension_numbers = #tpu.dot_dimension_numbers<[1], [0], [0], [1], [0, 0, 1, 1], [], []>} : vector<16x64xbf16>, vector<64x64xf32>, vector<16x64xf32> -> vector<16x64xf32>
    %c0_3 = arith.constant 0 : index
    %c0_4 = arith.constant 0 : index
    %3 = vector.load %arg3[%c0_3, %c0_4] : memref<1x64xf32, #tpu.memory_space<vmem>>, vector<1x64xf32>
    %4 = vector.broadcast %3 : vector<1x64xf32> to vector<16x64xf32>
    %5 = arith.addf %2, %4 : vector<16x64xf32>
    %cst_5 = arith.constant 0.000000e+00 : f32
    %6 = vector.broadcast %cst_5 : f32 to vector<16x64xf32>
    %7 = arith.maximumf %5, %6 : vector<16x64xf32>
    %cst_6 = arith.constant 1.000000e+00 : f32
    %8 = vector.broadcast %cst_6 : f32 to vector<1x16xf32>
    %cst_7 = arith.constant dense<0.000000e+00> : vector<1x64xf32>
    %9 = tpu.matmul %8, %7, %cst_7 {dimension_numbers = #tpu.dot_dimension_numbers<[1], [0], [0], [1], [0, 0, 1, 1], [], []>} : vector<1x16xf32>, vector<16x64xf32>, vector<1x64xf32> -> vector<1x64xf32>
    %10 = arith.mulf %7, %7 : vector<16x64xf32>
    %cst_8 = arith.constant dense<0.000000e+00> : vector<1x64xf32>
    %11 = tpu.matmul %8, %10, %cst_8 {dimension_numbers = #tpu.dot_dimension_numbers<[1], [0], [0], [1], [0, 0, 1, 1], [], []>} : vector<1x16xf32>, vector<16x64xf32>, vector<1x64xf32> -> vector<1x64xf32>
    %12 = tpu.concatenate %9, %11 in 1 : vector<1x64xf32>, vector<1x64xf32> -> vector<1x128xf32>
    %13 = vector.shape_cast %12 : vector<1x128xf32> to vector<1x1x128xf32>
    %c0_9 = arith.constant 0 : index
    %c0_10 = arith.constant 0 : index
    %c0_11 = arith.constant 0 : index
    %14 = vector.load %arg5[%c0_9, %c0_10, %c0_11] : memref<1x1x128xf32, #tpu.memory_space<vmem>>, vector<1x1x128xf32>
    tpu.vector_store %arg5[%c0_9, %c0_10, %c0_11], %13 {strides = array<i32>} : memref<1x1x128xf32, #tpu.memory_space<vmem>>, vector<1x1x128xf32>,
    %15 = arith.truncf %7 : vector<16x64xf32> to vector<16x64xbf16>
    %c0_12 = arith.constant 0 : index
    %c0_13 = arith.constant 0 : index
    %16 = vector.load %arg4[%c0_12, %c0_13] : memref<16x64xbf16, #tpu.memory_space<vmem>>, vector<16x64xbf16>
    tpu.vector_store %arg4[%c0_12, %c0_13], %15 {strides = array<i32>} : memref<16x64xbf16, #tpu.memory_space<vmem>>, vector<16x64xbf16>,
    return
  }
  func.func @transform_0(%arg0: i32) -> (i32, i32) {
    %c0_i32 = arith.constant 0 : i32
    %c0_i32_0 = arith.constant 0 : i32
    return %arg0, %c0_i32 : i32, i32
  }
  func.func @transform_1(%arg0: i32) -> (i32, i32) {
    %c0_i32 = arith.constant 0 : i32
    %c0_i32_0 = arith.constant 0 : i32
    %c0_i32_1 = arith.constant 0 : i32
    return %c0_i32, %c0_i32_0 : i32, i32
  }
  func.func @transform_2(%arg0: i32) -> (i32, i32) {
    %c0_i32 = arith.constant 0 : i32
    %c0_i32_0 = arith.constant 0 : i32
    %c0_i32_1 = arith.constant 0 : i32
    return %c0_i32, %c0_i32_0 : i32, i32
  }
  func.func @transform_3(%arg0: i32) -> (i32, i32) {
    %c0_i32 = arith.constant 0 : i32
    %c0_i32_0 = arith.constant 0 : i32
    return %arg0, %c0_i32 : i32, i32
  }
  func.func @transform_4(%arg0: i32) -> (i32, i32, i32) {
    %c0_i32 = arith.constant 0 : i32
    %c0_i32_0 = arith.constant 0 : i32
    %c0_i32_1 = arith.constant 0 : i32
    return %arg0, %c0_i32, %c0_i32_0 : i32, i32, i32
  }
}

module attributes {stable_mosaic.version = 11 : i64} {
  func.func @_stage3_kernel(%arg0: i32, %arg1: memref<16x64xbf16, #tpu.memory_space<vmem>>, %arg2: memref<1x64xf32, #tpu.memory_space<vmem>>, %arg3: memref<1x64xf32, #tpu.memory_space<vmem>>, %arg4: memref<16x64xbf16, #tpu.memory_space<vmem>>, %arg5: memref<1x64xf32, #tpu.memory_space<vmem>>, %arg6: memref<1x1xf32, #tpu.memory_space<vmem>>, %arg7: memref<1x1x16xf32, #tpu.memory_space<vmem>>) attributes {dimension_semantics = [#tpu.dimension_semantics<parallel>], iteration_bounds = array<i64: 1>, scalar_prefetch = 0 : i64, scratch_operands = 0 : i64, tpu.core_type = #tpu.core_type<tc>, window_params = [{transform_indices = @transform_0, window_bounds = array<i64: 16, 64>}, {pipeline_mode = #tpu.pipeline_mode<synchronous>, transform_indices = @transform_1, window_bounds = array<i64: 1, 64>}, {pipeline_mode = #tpu.pipeline_mode<synchronous>, transform_indices = @transform_2, window_bounds = array<i64: 1, 64>}, {transform_indices = @transform_3, window_bounds = array<i64: 16, 64>}, {pipeline_mode = #tpu.pipeline_mode<synchronous>, transform_indices = @transform_4, window_bounds = array<i64: 1, 64>}, {pipeline_mode = #tpu.pipeline_mode<synchronous>, transform_indices = @transform_5, window_bounds = array<i64: 1, 1>}, {transform_indices = @transform_6, window_bounds = array<i64: 1, 1, 16>}]} {
    %c0 = arith.constant 0 : index
    %c0_0 = arith.constant 0 : index
    %0 = vector.load %arg1[%c0, %c0_0] : memref<16x64xbf16, #tpu.memory_space<vmem>>, vector<16x64xbf16>
    %1 = arith.extf %0 : vector<16x64xbf16> to vector<16x64xf32>
    %c0_1 = arith.constant 0 : index
    %c0_2 = arith.constant 0 : index
    %2 = vector.load %arg2[%c0_1, %c0_2] : memref<1x64xf32, #tpu.memory_space<vmem>>, vector<1x64xf32>
    %3 = vector.broadcast %2 : vector<1x64xf32> to vector<16x64xf32>
    %4 = arith.mulf %1, %3 : vector<16x64xf32>
    %c0_3 = arith.constant 0 : index
    %c0_4 = arith.constant 0 : index
    %5 = vector.load %arg3[%c0_3, %c0_4] : memref<1x64xf32, #tpu.memory_space<vmem>>, vector<1x64xf32>
    %6 = vector.broadcast %5 : vector<1x64xf32> to vector<16x64xf32>
    %7 = arith.addf %4, %6 : vector<16x64xf32>
    %c0_5 = arith.constant 0 : index
    %c0_6 = arith.constant 0 : index
    %8 = vector.load %arg4[%c0_5, %c0_6] : memref<16x64xbf16, #tpu.memory_space<vmem>>, vector<16x64xbf16>
    %9 = arith.extf %8 : vector<16x64xbf16> to vector<16x64xf32>
    %10 = arith.mulf %7, %9 : vector<16x64xf32>
    %c0_7 = arith.constant 0 : index
    %c0_8 = arith.constant 0 : index
    %11 = vector.load %arg5[%c0_7, %c0_8] : memref<1x64xf32, #tpu.memory_space<vmem>>, vector<1x64xf32>
    %cst = arith.constant dense<0.000000e+00> : vector<1x16xf32>
    %12 = tpu.matmul %11, %10, %cst {dimension_numbers = #tpu.dot_dimension_numbers<[1], [1], [0], [0], [0, 0, 1, 0], [], []>} : vector<1x64xf32>, vector<16x64xf32>, vector<1x16xf32> -> vector<1x16xf32>
    %c0_9 = arith.constant 0 : index
    %c0_10 = arith.constant 0 : index
    %13 = vector.load %arg6[%c0_9, %c0_10] : memref<1x1xf32, #tpu.memory_space<vmem>>, vector<1x1xf32>
    %14 = vector.broadcast %13 : vector<1x1xf32> to vector<1x16xf32>
    %15 = arith.addf %12, %14 : vector<1x16xf32>
    %16 = vector.shape_cast %15 : vector<1x16xf32> to vector<1x1x16xf32>
    %c0_11 = arith.constant 0 : index
    %c0_12 = arith.constant 0 : index
    %c0_13 = arith.constant 0 : index
    %17 = vector.load %arg7[%c0_11, %c0_12, %c0_13] : memref<1x1x16xf32, #tpu.memory_space<vmem>>, vector<1x1x16xf32>
    tpu.vector_store %arg7[%c0_11, %c0_12, %c0_13], %16 {strides = array<i32>} : memref<1x1x16xf32, #tpu.memory_space<vmem>>, vector<1x1x16xf32>,
    return
  }
  func.func @transform_0(%arg0: i32) -> (i32, i32) {
    %c0_i32 = arith.constant 0 : i32
    %c0_i32_0 = arith.constant 0 : i32
    return %arg0, %c0_i32 : i32, i32
  }
  func.func @transform_1(%arg0: i32) -> (i32, i32) {
    %c0_i32 = arith.constant 0 : i32
    %c0_i32_0 = arith.constant 0 : i32
    %c0_i32_1 = arith.constant 0 : i32
    return %c0_i32, %c0_i32_0 : i32, i32
  }
  func.func @transform_2(%arg0: i32) -> (i32, i32) {
    %c0_i32 = arith.constant 0 : i32
    %c0_i32_0 = arith.constant 0 : i32
    %c0_i32_1 = arith.constant 0 : i32
    return %c0_i32, %c0_i32_0 : i32, i32
  }
  func.func @transform_3(%arg0: i32) -> (i32, i32) {
    %c0_i32 = arith.constant 0 : i32
    %c0_i32_0 = arith.constant 0 : i32
    return %arg0, %c0_i32 : i32, i32
  }
  func.func @transform_4(%arg0: i32) -> (i32, i32) {
    %c0_i32 = arith.constant 0 : i32
    %c0_i32_0 = arith.constant 0 : i32
    %c0_i32_1 = arith.constant 0 : i32
    return %c0_i32, %c0_i32_0 : i32, i32
  }
  func.func @transform_5(%arg0: i32) -> (i32, i32) {
    %c0_i32 = arith.constant 0 : i32
    %c0_i32_0 = arith.constant 0 : i32
    %c0_i32_1 = arith.constant 0 : i32
    return %c0_i32, %c0_i32_0 : i32, i32
  }
  func.func @transform_6(%arg0: i32) -> (i32, i32, i32) {
    %c0_i32 = arith.constant 0 : i32
    %c0_i32_0 = arith.constant 0 : i32
    %c0_i32_1 = arith.constant 0 : i32
    return %arg0, %c0_i32, %c0_i32_0 : i32, i32, i32
  }
}

</mosaic_0001>

<bundles_post_ra>
// kernel: binary_classification_forward.4
= control target key start
LH: loop header
LB: loop body
LE: loop exit
PB: predicated region body
PF: predicated region fallthrough
CT: control target
= control target key end

     0   :  { %v352_v0 = vmov 0.0   ;;  %vm353_vm0 = vmmov 0   ;;  %vm39_vm1 = vcmask 523264   ;;  %vm278_vm2 = vcmask 519168   ;;  %s355_s10 = smov 64   ;;  %s425_s1 = inlined_call_operand.vmem [shape: f32[64,64], index: 1, kind: input, shape index: {}]   ;;  %s426_s0 = inlined_call_operand.vmem [shape: bf16[16,64], index: 0, kind: input, shape index: {}]   ;;  %s427_s2 = inlined_call_operand.vmem [shape: f32[1,64], index: 2, kind: input, shape index: {}]   ;;  %s428_s3 = inlined_call_operand.vmem [shape: bf16[16,64], index: 3, kind: output, shape index: {0}]   ;;  %s429_s4 = inlined_call_operand.vmem [shape: f32[1,1,128], index: 4, kind: output, shape index: {1}]  }
   0x1   :  { %313 = vmatprep.subr.mxu0 %v352_v0  ;;  %v26_v1 = vld [vmem:[%s425_s1 + $0x38] sm:$0xff]  ;;  %v25_v2 = vld [vmem:[%s425_s1 + $0x30] sm:$0xff]  ;;  %329 = vmatprep.mubr.msk.bf16.mxu0 %vm353_vm0, %v352_v0  ;;  %v24_v3 = vld [vmem:[%s425_s1 + $0x28] sm:$0xff]  ;;  %vm118_vm3 = vcmask 130048   ;;  %v354_v22 = vmov 1.0  }
   0x2   :  { %314 = vmatpush3.msra.mxu0 %v26_v1  ;;  %333 = vmatprep.subr.mxu1 %v352_v0  ;;  %v23_v4 = vld [vmem:[%s425_s1 + $0x20] sm:$0xff]  ;;  %v22_v5 = vld [vmem:[%s425_s1 + $0x18] sm:$0xff]  ;;  %v21_v6 = vld [vmem:[%s425_s1 + $0x10] sm:$0xff] }
   0x3   :  { %315 = vmatprep.subr.mxu0 %v352_v0  ;;  %337 = vmatprep.mubr.msk.f32.mxu1 %vm353_vm0, %v352_v0  ;;  %v20_v7 = vld [vmem:[%s425_s1 + $0x8] sm:$0xff]  ;;  %v19_v8 = vld [vmem:[%s425_s1] sm:$0xff] }
   0x4   :  { %316 = vmatpush3.msra.mxu0 %v25_v2  ;;  %v351_v9 = vld [vmem:[%s426_s0] sm:$0xff]  }
   0x5   :  { %317 = vmatprep.subr.mxu0 %v352_v0  ;;  %v289_v10 = vld [vmem:[%s427_s2] ss:$0 sm:$0xff] }
   0x6   :  { %318 = vmatpush3.msra.mxu0 %v24_v3 }
   0x7   :  { %319 = vmatprep.subr.mxu0 %v352_v0 }
   0x8   :  { %320 = vmatpush3.msra.mxu0 %v23_v4 }
   0x9   :  { %321 = vmatprep.subr.mxu0 %v352_v0 }
   0xa   :  { %322 = vmatpush3.msra.mxu0 %v22_v5 }
   0xb   :  { %323 = vmatprep.subr.mxu0 %v352_v0 }
   0xc   :  { %324 = vmatpush3.msra.mxu0 %v21_v6 }
   0xd   :  { %325 = vmatprep.subr.mxu0 %v352_v0 }
   0xe   :  { %326 = vmatpush3.msra.mxu0 %v20_v7 }
   0xf   :  { %327 = vmatprep.subr.mxu0 %v352_v0 }
  0x10   :  { %328 = vmatpush3.msra.mxu0 %v19_v8 }
  0x11   :  { %330 = vmatmul.mubr.msk.bf16.vlgmr.msra.gmra.mxu0 %vm39_vm1, %v351_v9 }
  0xd1   :  { %v109_v11 = vpop.f32.mrf.mxu0 }
  0xd2   :  { %v110_v12 = vadd.f32 %v289_v10, %v109_v11 }
  0xd3   :  { %v331_v13 = vpop.f32.mrf.mxu0 }
  0xd4   :  { %v116_v14 = vmax.f32 %v110_v12, 0.0 }
  0xd5   :  { %v112_v15 = vpop.f32.mrf.mxu0 }
  0xd6   :  { %v296_v16 = vpack.c.bf16 %v116_v14, %v116_v14  ;;  %v113_v17 = vadd.f32 %v289_v10, %v112_v15  ;;  %v192_v23 = vmul.f32 %v116_v14, %v116_v14 }
  0xd7   :  { %v332_v18 = vpop.f32.mrf.mxu0 }
  0xd8   :  { %279 = vst.msk [vmem:[%s428_s3] sm:$0xf] %vm278_vm2, %v296_v16  ;;  %v117_v19 = vmax.f32 %v113_v17, 0.0 }
  0xda   :  { %v297_v20 = vpack.c.bf16 %v117_v19, %v117_v19  ;;  %334 = vmatpush3.msra.mxu1 %v117_v19  ;;  %v193_v21 = vmul.f32 %v117_v19, %v117_v19 }
  0xdb   :  { %335 = vmatprep.subr.mxu1 %v352_v0 }
  0xdc   :  { %280 = vst.msk [vmem:[%s428_s3 + $0x4] sm:$0xf] %vm278_vm2, %v297_v20  ;;  %336 = vmatpush3.msra.mxu1 %v116_v14 }
  0xdd   :  { %338 = vmatmul.mubr.msk.f32.vlgmr.msra.gmra.mxu1 %vm118_vm3, %v354_v22  ;;  %340 = vmatprep.subr.mxu1 %v352_v0 }
  0xde   :  { %341 = vmatpush3.msra.mxu1 %v193_v21  ;;  %344 = vmatprep.mubr.msk.f32.mxu1 %vm353_vm0, %v352_v0 }
  0xdf   :  { %342 = vmatprep.subr.mxu1 %v352_v0 }
  0xe0   :  { %343 = vmatpush3.msra.mxu1 %v192_v23 }
  0xe1   :  { %345 = vmatmul.mubr.msk.f32.vlgmr.msra.gmra.mxu1 %vm118_vm3, %v354_v22 }
 0x19d   :  { %v188_v24 = vpop.f32.mrf.mxu1 }
 0x19f   :  { %v339_v25 = vpop.f32.mrf.mxu1 }
 0x1a1   :  { %v260_v26 = vpop.f32.mrf.mxu1 }
 0x1a2   :  { %265 = vrot.lane.b32.xlu0 %v260_v26, %s355_s10 }
 0x1a3   :  { %v346_v27 = vpop.f32.mrf.mxu1 }
 0x214   :  { %v266_v28 = vpop.permute.xlu0 %265 }
 0x215   :  { %v268_v29 = vsel %vm39_vm1, %v188_v24, %v266_v28 }
 0x216   :  { %269 = vst [vmem:[%s429_s4] sm:$0x1] %v268_v29 }

// kernel: binary_classification_forward.3
= control target key start
LH: loop header
LB: loop body
LE: loop exit
PB: predicated region body
PF: predicated region fallthrough
CT: control target
= control target key end

     0   :  { %10 = vsyncpa [#allocation3], 0  ;;  %s359_s15 = smov [#allocation2]   ;;  %s410_s0 = inlined_call_operand.vmem [shape: f32[16,8], index: 0, kind: input, shape index: {}]   ;;  %s411_s1 = inlined_call_operand.vmem [shape: f32[8,64], index: 1, kind: input, shape index: {}]   ;;  %s412_s2 = inlined_call_operand.hbm [shape: f32[1,64], index: 2, kind: input, shape index: {}]   ;;  %s413_s3 = inlined_call_operand.vmem [shape: bf16[16,64], index: 3, kind: output, shape index: {0}]   ;;  %s414_s4 = inlined_call_operand.vmem [shape: f32[1,1,128], index: 4, kind: output, shape index: {1}]  }
   0x1   :  { %s21_s16 = sshll.u32 %s359_s15, 4  ;;  %s22_s16 = int_to_ptr.vmem [resolvable:$true] %s21_s16 }
   0x2   :  { %s345_s17 = scalar_lea.vmem %s22_s16, 16  ;;  %s349_s18 = scalar_lea.vmem %s22_s16, 32 }
   0x3   :  { %p346_p0 = scmp.ne.s32.totalorder %s22_s16, %s345_s17  ;;  %p350_p1 = scmp.lt.s32.totalorder %s22_s16, %s22_s16 }
   0x4   :  { %p351_p2 = scmp.lt.s32.totalorder %s349_s18, %s345_s17 }
   0x6   :  { %p352_p3 = por %p351_p2, %p350_p1 }
   0x8   :  { %p353_p4 = pnand %p352_p3, %p346_p0 }
   0xa   :  { %356 = shalt.err (!%p353_p4)
}
   0xb   :  { %24 = dma.hbm_to_vmem [thread:$0]  %s412_s2, 16, %s22_s16, [#allocation3]  }
   0xc   :  { %357 = dma.done.wait [#allocation3], 16  }
   0xd   :  { %358 = vsyncadd [#allocation3], 4294967280  ;;  %vm38_vm0 = vcmask 64512   ;;  %v30_v0 = vld [vmem:[%s411_s1] sm:$0xff]  ;;  %v29_v2 = vld [vmem:[%s410_s0 + $0x8] sm:$0xff]  ;;  %v360_v3 = vmov 0.0  }
   0xe   :  { %v28_v1 = vld [vmem:[%s410_s0] sm:$0xff]  ;;  %313 = vmatprep.subr.mxu0 %v30_v0  ;;  %318 = vmatprep.subr.mxu1 %v360_v3  ;;  %vm361_vm1 = vmmov 0   ;;  %vm283_vm2 = vcmask 519168   ;;  %vm122_vm3 = vcmask 130048   ;;  %v362_v15 = vmov 1.0   ;;  %s363_s28 = smov 64  }
   0xf   :  { %315 = vmatprep.mubr.msk.f32.mxu0 %vm38_vm0, %v28_v1  ;;  %314 = vmatpush3.msra.mxu0 %v30_v0  ;;  %v295_v4 = vld [vmem:[#allocation2] ss:$0 sm:$0xff]  ;;  %vm272_vm4 = vcmask 523264  }
  0x10   :  { %316 = vmatmul.mubr.msk.f32.vlgmr.msra.gmra.mxu0 %vm38_vm0, %v29_v2  ;;  %325 = vmatprep.subr.mxu0 %v360_v3 }
  0x11   :  { %329 = vmatprep.mubr.msk.f32.mxu0 %vm361_vm1, %v360_v3  ;;  %322 = vmatprep.mubr.msk.f32.mxu1 %vm361_vm1, %v360_v3 }
  0xd0   :  { %v317_v5 = vpop.f32.mrf.mxu0 }
  0xd1   :  { %v117_v6 = vadd.f32 %v317_v5, %v295_v4 }
  0xd2   :  { %v111_v7 = vpop.f32.mrf.mxu0 }
  0xd3   :  { %v121_v8 = vmax.f32 %v117_v6, 0.0  ;;  %v112_v9 = vadd.f32 %v295_v4, %v111_v7 }
  0xd5   :  { %v197_v10 = vmul.f32 %v121_v8, %v121_v8  ;;  %v303_v11 = vpack.c.bf16 %v121_v8, %v121_v8  ;;  %v120_v12 = vmax.f32 %v112_v9, 0.0  ;;  %319 = vmatpush3.msra.mxu1 %v121_v8 }
  0xd6   :  { %320 = vmatprep.subr.mxu1 %v360_v3 }
  0xd7   :  { %285 = vst.msk [vmem:[%s413_s3 + $0x4] sm:$0xf] %vm283_vm2, %v303_v11  ;;  %v196_v13 = vmul.f32 %v120_v12, %v120_v12  ;;  %v302_v14 = vpack.c.bf16 %v120_v12, %v120_v12  ;;  %321 = vmatpush3.msra.mxu1 %v120_v12  ;;  %326 = vmatpush3.msra.mxu0 %v197_v10 }
  0xd8   :  { %327 = vmatprep.subr.mxu0 %v360_v3  ;;  %323 = vmatmul.mubr.msk.f32.vlgmr.msra.gmra.mxu1 %vm122_vm3, %v362_v15 }
  0xd9   :  { %284 = vst.msk [vmem:[%s413_s3] sm:$0xf] %vm283_vm2, %v302_v14  ;;  %328 = vmatpush3.msra.mxu0 %v196_v13 }
  0xda   :  { %330 = vmatmul.mubr.msk.f32.vlgmr.msra.gmra.mxu0 %vm122_vm3, %v362_v15 }
 0x198   :  { %v192_v16 = vpop.f32.mrf.mxu1 }
 0x19a   :  { %v264_v17 = vpop.f32.mrf.mxu0  ;;  %v324_v18 = vpop.f32.mrf.mxu1 }
 0x19b   :  { %269 = vrot.lane.b32.xlu0 %v264_v17, %s363_s28 }
 0x19c   :  { %v331_v19 = vpop.f32.mrf.mxu0 }
 0x20d   :  { %v270_v20 = vpop.permute.xlu0 %269 }
 0x20e   :  { %v273_v21 = vsel %vm272_vm4, %v192_v16, %v270_v20 }
 0x20f   :  { %274 = vst [vmem:[%s414_s4] sm:$0x1] %v273_v21 }
 0x210   :  { %294 = vsyncpa [#allocation3], 1 }

// kernel: binary_classification_forward.5
= control target key start
LH: loop header
LB: loop body
LE: loop exit
PB: predicated region body
PF: predicated region fallthrough
CT: control target
= control target key end

     0   :  { %s271_s0 = inlined_call_operand.vmem [shape: bf16[16,64], index: 0, kind: input, shape index: {}]   ;;  %s272_s1 = inlined_call_operand.vmem [shape: f32[1,64], index: 1, kind: input, shape index: {}]   ;;  %s273_s2 = inlined_call_operand.vmem [shape: f32[1,64], index: 2, kind: input, shape index: {}]   ;;  %s274_s3 = inlined_call_operand.vmem [shape: bf16[16,64], index: 3, kind: input, shape index: {}]   ;;  %s275_s4 = inlined_call_operand.vmem [shape: f32[1,64], index: 4, kind: input, shape index: {}]   ;;  %s276_s5 = inlined_call_operand.<no memory space> [shape: f32[1,1], index: 5, kind: input, shape index: {}]   ;;  %s277_s6 = inlined_call_operand.hbm [shape: f32[1,1,16], index: 6, kind: output, shape index: {}]  }
   0x1   :  { %v11_v0 = vstv %s276_s5 }
   0x2   :  { %12 = vst [vmem:[#allocation2] sm:$0x1] %v11_v0 }
   0x3   :  { %v167_v1 = vld [vmem:[%s271_s0] sm:$0xff]   ;;  %v211_v3 = vmov 0.0   ;;  %vm212_vm0 = vmmov 0  }
   0x4   :  { %v161_v2 = vld [vmem:[%s272_s1] ss:$0 sm:$0xff]  ;;  %177 = vmatprep.subr.mxu0 %v211_v3  ;;  %v168_v4 = vunpack.c.l.bf16 %v167_v1  ;;  %v169_v5 = vunpack.c.h.bf16 %v167_v1  ;;  %181 = vmatprep.mubr.msk.f32.mxu0 %vm212_vm0, %v211_v3 }
   0x5   :  { %v162_v6 = vld [vmem:[%s273_s2] ss:$0 sm:$0xff] }
   0x6   :  { %v171_v7 = vld [vmem:[%s274_s3] sm:$0xff]  }
   0x9   :  { %v55_v8 = vld [vmem:[#allocation2] sm:$0x1] }
   0xa   :  { %13 = vsyncpa [#allocation4], 0  ;;  %v37_v9 = vmul.f32 %v168_v4, %v161_v2  ;;  %v38_v10 = vmul.f32 %v169_v5, %v161_v2  ;;  %v173_v11 = vunpack.c.h.bf16 %v171_v7  ;;  %v213_v12 = vmov 0   ;;  %v54_v18 = vld [vmem:[%s275_s4] sm:$0x1]  ;;  %s214_s2 = smov [#allocation3]  }
   0xb   :  { %188 = vset.pattern.permute.xlu0 %v213_v12  ;;  %v172_v15 = vunpack.c.l.bf16 %v171_v7  ;;  %vm65_vm1 = vcmask 523264   ;;  %v61_v19 = vlaneseq  ;;  %s153_s3 = sshll.u32 %s214_s2, 4  ;;  %vm145_vm2 = vcmask 122880   ;;  %s154_s3 = int_to_ptr.vmem [resolvable:$true] %s153_s3 }
   0xc   :  { %58 = vperm.xlu0 %188, %v55_v8   ;;  %v46_v13 = vadd.f32 %v162_v6, %v37_v9  ;;  %v47_v14 = vadd.f32 %v162_v6, %v38_v10  ;;  %s189_s5 = scalar_lea.vmem %s154_s3, 16  ;;  %s193_s7 = scalar_lea.vmem %s154_s3, 32 }
   0xd   :  { %v62_v20 = vshrl.u32 %v61_v19, 7  ;;  %p190_p0 = scmp.ne.s32.totalorder %s154_s3, %s189_s5  ;;  %p194_p1 = scmp.lt.s32.totalorder %s154_s3, %s154_s3 }
   0xe   :  { %v53_v16 = vmul.f32 %v173_v11, %v47_v14  ;;  %v52_v17 = vmul.f32 %v172_v15, %v46_v13  ;;  %p195_p2 = scmp.lt.s32.totalorder %s193_s7, %s189_s5 }
   0xf   :  { %v63_v21 = vsub.s32 0, %v62_v20 }
  0x10   :  { %178 = vmatpush3.xpose.msk.msra.mxu0 %vm65_vm1, %v53_v16  ;;  %p196_p3 = por %p195_p2, %p194_p1 }
  0x11   :  { %179 = vmatprep.subr.mxu0 %v211_v3 }
  0x12   :  { %p197_p4 = pnand %p196_p3, %p190_p0 }
  0x14   :  { %180 = vmatpush3.xpose.msk.msra.mxu0 %vm65_vm1, %v52_v17 }
  0x17   :  { %182 = vmatmul.mubr.msk.f32.vlgmr.msra.gmra.mxu0 %vm65_vm1, %v54_v18 }
  0x87   :  { %v59_v22 = vpop.permute.xlu0 %58 }
  0x88   :  { %v64_v23 = vrot.slane %v59_v22, %v63_v21 }
  0xd7   :  { %v141_v24 = vpop.f32.mrf.mxu0 }
  0xd8   :  { %v142_v25 = vadd.f32 %v141_v24, %v64_v23 }
  0xd9   :  { %v183_v26 = vpop.f32.mrf.mxu0 }
  0xda   :  { %146 = vst.msk [vmem:[#allocation3] sm:$0x1] %vm145_vm2, %v142_v25 }
  0xdb   :  { %200 = shalt.err (!%p197_p4)
}
  0xdc   :  { %156 = dma.vmem_to_hbm [thread:$0]  %s154_s3, 16, %s277_s6, [#allocation4]  }
  0xdd   :  { %209 = dma.done.wait [#allocation4], 16  }
  0xde   :  { %210 = vsyncadd [#allocation4], 4294967280 }
  0xdf   :  { %160 = vsyncpa [#allocation4], 1 }

</bundles_post_ra>
